<compile_context>
chip_gen: v7x
topology: tpu7x:2x2x1
jax: 0.10.0
libtpu: 0.0.40
codegen_flags: <defaults>
</compile_context>

<pallas_src>
import functools

import jax
import jax.numpy as jnp
from jax.experimental import pallas as pl
from jax.experimental.pallas import tpu as pltpu

LANE = 128
BF16_SUBLANE = 16  # bf16 rows pack in pairs -> keep row tiles multiples of 16


def _round_up(x, m):
    return (x + m - 1) // m * m


# ----------------------------------------------------------------------------
# Pallas kernel: fused  (patches @ W_folded) + bn_bias  ->  SiLU  (bf16 store)
# ----------------------------------------------------------------------------
def _stem_kernel(p_ref, w_ref, b_ref, o_ref):
    # p_ref: (TM, KDp)  bf16 im2col patches tile
    # w_ref: (KDp, Cp)  bf16 conv weight with BN scale folded in (resident)
    # b_ref: (1, Cp)    f32 folded BN bias (resident)
    # o_ref: (TM, Cp)   bf16 output tile (lane-dense: Cp multiple of 128)
    acc = jnp.dot(p_ref[...], w_ref[...], preferred_element_type=jnp.float32)
    y = acc + b_ref[...]                                  # f32 epilogue (v5e-safe)
    o_ref[...] = (y * jax.nn.sigmoid(y)).astype(o_ref.dtype)   # SiLU, bf16 store


def _fused_conv_bn_silu(patches, w_mat, bias, *, tm):
    m_p, kd_p = patches.shape
    _, c_p = w_mat.shape
    assert m_p % tm == 0
    grid = (m_p // tm,)
    return pl.pallas_call(
        _stem_kernel,
        out_shape=jax.ShapeDtypeStruct((m_p, c_p), jnp.bfloat16),
        grid=grid,
        in_specs=[
            pl.BlockSpec((tm, kd_p), lambda i: (i, 0)),     # tiled over M
            pl.BlockSpec((kd_p, c_p), lambda i: (0, 0)),    # resident weight
            pl.BlockSpec((1, c_p), lambda i: (0, 0)),       # resident bias
        ],
        out_specs=pl.BlockSpec((tm, c_p), lambda i: (i, 0)),
        compiler_params=pltpu.CompilerParams(
            # M-tiles are independent -> shard across TensorCores on v7x.
            dimension_semantics=("parallel",),
            vmem_limit_bytes=32 * 1024 * 1024),
    )(patches, w_mat, bias)


# ----------------------------------------------------------------------------
# Glue: tiling choice, padded im2col, parameter folding (plain JAX)
# ----------------------------------------------------------------------------
def _choose_tiling(m, tm_max):
    """Rows per tile (multiple of 16 for bf16 sublane packing) and padded M.
    Keeps the grid length even when >1 tile so v7x's two TensorCores split the
    'parallel' axis evenly."""
    m_aligned = _round_up(m, BF16_SUBLANE)
    if m_aligned <= tm_max:
        return m_aligned, m_aligned                        # single tile
    g = -(-m_aligned // tm_max)                            # cdiv
    if g % 2:
        g += 1                                             # even grid for 2 TCs
    tm = _round_up(-(-m_aligned // g), BF16_SUBLANE)
    return tm, tm * g


def _im2col_padded(x_nchw, k, stride, pad, kd_p, m_p, dtype):
    """NCHW -> (m_p, kd_p) patches, emitted already zero-padded in both dims.
    Inner flatten order is (cin, kh, kw) to match PyTorch's (Cout, Cin, KH, KW)
    weight flattening.  Building the padded shape directly (zero taps appended,
    rows padded per column before the stack) avoids a separate full-array
    jnp.pad pass over the materialized patches tensor."""
    n, c, h, w = x_nchw.shape
    oh = (h + 2 * pad - k) // stride + 1
    ow = (w + 2 * pad - k) // stride + 1
    m = n * oh * ow
    xp = jnp.pad(x_nchw.astype(dtype), ((0, 0), (0, 0), (pad, pad), (pad, pad)))
    cols = []
    for ci in range(c):
        for kh in range(k):
            for kw in range(k):
                tap = xp[:, ci,
                         kh:kh + stride * oh:stride,
                         kw:kw + stride * ow:stride]       # (n, oh, ow)
                cols.append(jnp.pad(tap.reshape(m), (0, m_p - m)))
    zero_col = jnp.zeros((m_p,), dtype)
    cols.extend([zero_col] * (kd_p - c * k * k))
    patches = jnp.stack(cols, axis=-1)                     # (m_p, kd_p)
    return patches, (n, oh, ow)


@functools.partial(jax.jit, static_argnums=(5, 6, 7))
def first_net_forward(x_nchw, conv_w, gamma, beta, mean_var, stride=2, pad=1,
                      tm=8192):
    """Stem of EfficientNet-B7: conv3x3(s2) -> BN(eval) -> SiLU.  NCHW in/out."""
    mean, var = mean_var
    cout, cin, k, _ = conv_w.shape
    eps = 1e-5

    # Fold BN scale into the conv weight (exact, tiny host-side op);
    # only the bias vector is applied in-kernel.
    scale = (gamma.astype(jnp.float32)
             / jnp.sqrt(var.astype(jnp.float32) + eps))                 # (Cout,)
    bias = beta.astype(jnp.float32) - mean.astype(jnp.float32) * scale   # (Cout,)
    w_fold = conv_w.astype(jnp.float32) * scale[:, None, None, None]
    w_mat = w_fold.reshape(cout, cin * k * k).T                          # (KD, Cout)

    kd = cin * k * k
    kd_p = _round_up(kd, 32)          # 27 -> 32: clean contraction packing
    c_p = _round_up(cout, LANE)       # lane-dense output, unmasked stores

    n, _, h, w = x_nchw.shape
    oh = (h + 2 * pad - k) // stride + 1
    ow = (w + 2 * pad - k) // stride + 1
    m = n * oh * ow
    tm_eff, m_p = _choose_tiling(m, tm)

    patches, _ = _im2col_padded(x_nchw, k, stride, pad, kd_p, m_p, jnp.bfloat16)
    w_pad = jnp.pad(w_mat, ((0, kd_p - kd), (0, c_p - cout))).astype(jnp.bfloat16)
    bias_pad = jnp.pad(bias, (0, c_p - cout)).reshape(1, c_p)            # f32

    out_flat = _fused_conv_bn_silu(patches, w_pad, bias_pad, tm=tm_eff)  # bf16

    # Drop padding + NHWC -> NCHW while still bf16; upcast once at the
    # PyTorch boundary.
    out = out_flat[:m, :cout].reshape(n, oh, ow, cout)
    return jnp.transpose(out, (0, 3, 1, 2)).astype(jnp.float32)


# ----------------------------------------------------------------------------
# Pure-JAX reference (for validation)
# ----------------------------------------------------------------------------
def _reference(x_nchw, conv_w, gamma, beta, mean_var, stride=2, pad=1):
    mean, var = mean_var
    eps = 1e-5
    y = jax.lax.conv_general_dilated(
        x_nchw.astype(jnp.float32), conv_w.astype(jnp.float32),
        window_strides=(stride, stride), padding=((pad, pad), (pad, pad)),
        dimension_numbers=("NCHW", "OIHW", "NCHW"))
    s = (gamma / jnp.sqrt(var + eps))[None, :, None, None]
    b = (beta - mean * gamma / jnp.sqrt(var + eps))[None, :, None, None]
    y = y * s + b
    return y * jax.nn.sigmoid(y)


# ----------------------------------------------------------------------------
if __name__ == "__main__":
    key = jax.random.PRNGKey(0)
    k_x, k_w, k_m, k_v = jax.random.split(key, 4)

    # Small shapes consistent with the stem: N=2, Cin=3, 16x16 spatial, Cout=32.
    N, CIN, H, W = 2, 3, 16, 16
    COUT, K = 32, 3

    x = jax.random.normal(k_x, (N, CIN, H, W), dtype=jnp.float32)
    conv_w = 0.1 * jax.random.normal(k_w, (COUT, CIN, K, K), dtype=jnp.float32)
    gamma = jnp.ones((COUT,), jnp.float32)
    beta = jnp.zeros((COUT,), jnp.float32)
    run_mean = 0.05 * jax.random.normal(k_m, (COUT,), dtype=jnp.float32)
    run_var = 1.0 + 0.1 * jax.nn.softplus(jax.random.normal(k_v, (COUT,)))

    out = first_net_forward(x, conv_w, gamma, beta, (run_mean, run_var))
    out = jax.block_until_ready(out)

    ref = _reference(x, conv_w, gamma, beta, (run_mean, run_var))
    assert out.shape == (N, COUT, H // 2, W // 2), out.shape
    assert bool(jnp.all(jnp.isfinite(out)))
    # bf16 MXU operands + bf16 output store, f32 accumulate: loose tolerance.
    err = float(jnp.max(jnp.abs(out - ref)))
    assert bool(jnp.allclose(out, ref, rtol=3e-2, atol=3e-2)), err

    print("KERNEL_OK")
</pallas_src>

<mosaic_0001>
module attributes {stable_mosaic.version = 11 : i64} {
  func.func @_stem_kernel(%arg0: i32, %arg1: memref<128x32xbf16, #tpu.memory_space<vmem>>, %arg2: memref<32x128xbf16, #tpu.memory_space<vmem>>, %arg3: memref<1x128xf32, #tpu.memory_space<vmem>>, %arg4: memref<128x128xbf16, #tpu.memory_space<vmem>>) attributes {dimension_semantics = [#tpu.dimension_semantics<parallel>], iteration_bounds = array<i64: 1>, scalar_prefetch = 0 : i64, scratch_operands = 0 : i64, tpu.core_type = #tpu.core_type<tc>, window_params = [{transform_indices = @transform_0, window_bounds = array<i64: 128, 32>}, {pipeline_mode = #tpu.pipeline_mode<synchronous>, transform_indices = @transform_1, window_bounds = array<i64: 32, 128>}, {pipeline_mode = #tpu.pipeline_mode<synchronous>, transform_indices = @transform_2, window_bounds = array<i64: 1, 128>}, {transform_indices = @transform_3, window_bounds = array<i64: 128, 128>}]} {
    %c0 = arith.constant 0 : index
    %c0_0 = arith.constant 0 : index
    %0 = vector.load %arg1[%c0, %c0_0] : memref<128x32xbf16, #tpu.memory_space<vmem>>, vector<128x32xbf16>
    %c0_1 = arith.constant 0 : index
    %c0_2 = arith.constant 0 : index
    %1 = vector.load %arg2[%c0_1, %c0_2] : memref<32x128xbf16, #tpu.memory_space<vmem>>, vector<32x128xbf16>
    %cst = arith.constant dense<0.000000e+00> : vector<128x128xf32>
    %2 = tpu.matmul %0, %1, %cst {dimension_numbers = #tpu.dot_dimension_numbers<[1], [0], [0], [1], [0, 0, 1, 1], [], []>} : vector<128x32xbf16>, vector<32x128xbf16>, vector<128x128xf32> -> vector<128x128xf32>
    %c0_3 = arith.constant 0 : index
    %c0_4 = arith.constant 0 : index
    %3 = vector.load %arg3[%c0_3, %c0_4] : memref<1x128xf32, #tpu.memory_space<vmem>>, vector<1x128xf32>
    %4 = vector.broadcast %3 : vector<1x128xf32> to vector<128x128xf32>
    %5 = arith.addf %2, %4 : vector<128x128xf32>
    %6 = arith.negf %5 : vector<128x128xf32>
    %7 = math.exp %6 : vector<128x128xf32>
    %cst_5 = arith.constant 1.000000e+00 : f32
    %8 = vector.broadcast %cst_5 : f32 to vector<128x128xf32>
    %9 = arith.addf %8, %7 : vector<128x128xf32>
    %10 = arith.divf %8, %9 : vector<128x128xf32>
    %11 = arith.mulf %5, %10 : vector<128x128xf32>
    %12 = arith.truncf %11 : vector<128x128xf32> to vector<128x128xbf16>
    %c0_6 = arith.constant 0 : index
    %c0_7 = arith.constant 0 : index
    %13 = vector.load %arg4[%c0_6, %c0_7] : memref<128x128xbf16, #tpu.memory_space<vmem>>, vector<128x128xbf16>
    tpu.vector_store %arg4[%c0_6, %c0_7], %12 {strides = array<i32>} : memref<128x128xbf16, #tpu.memory_space<vmem>>, vector<128x128xbf16>,
    return
  }
  func.func @transform_0(%arg0: i32) -> (i32, i32) {
    %c0_i32 = arith.constant 0 : i32
    %c0_i32_0 = arith.constant 0 : i32
    return %arg0, %c0_i32 : i32, i32
  }
  func.func @transform_1(%arg0: i32) -> (i32, i32) {
    %c0_i32 = arith.constant 0 : i32
    %c0_i32_0 = arith.constant 0 : i32
    %c0_i32_1 = arith.constant 0 : i32
    return %c0_i32, %c0_i32_0 : i32, i32
  }
  func.func @transform_2(%arg0: i32) -> (i32, i32) {
    %c0_i32 = arith.constant 0 : i32
    %c0_i32_0 = arith.constant 0 : i32
    %c0_i32_1 = arith.constant 0 : i32
    return %c0_i32, %c0_i32_0 : i32, i32
  }
  func.func @transform_3(%arg0: i32) -> (i32, i32) {
    %c0_i32 = arith.constant 0 : i32
    %c0_i32_0 = arith.constant 0 : i32
    return %arg0, %c0_i32 : i32, i32
  }
}

</mosaic_0001>

<bundles_post_ra>
// kernel: first_net_forward.1
= control target key start
LH: loop header
LB: loop body
LE: loop exit
PB: predicated region body
PF: predicated region fallthrough
CT: control target
= control target key end

     0   :  { %vm94_vm0 = vcmask 261120   ;;  %s801_s1 = inlined_call_operand.vmem [shape: bf16[32,128], index: 1, kind: input, shape index: {}]   ;;  %s802_s0 = inlined_call_operand.vmem [shape: bf16[128,32], index: 0, kind: input, shape index: {}]   ;;  %s803_s2 = inlined_call_operand.vmem [shape: f32[1,128], index: 2, kind: input, shape index: {}]   ;;  %s804_s3 = inlined_call_operand.vmem [shape: bf16[128,128], index: 3, kind: output, shape index: {}]  }
   0x1   :  { %v560_v0 = vld [vmem:[%s801_s1] sm:$0xff]   ;;  %v561_v1 = vld [vmem:[%s801_s1 + $0x8] sm:$0xff]   ;;  %v566_v6 = vld [vmem:[%s802_s0 + $0x10] sm:$0xff]  }
   0x2   :  { %536 = vmatprep.subr.bf16.mxu0 %v560_v0  ;;  %556 = vmatprep.subr.bf16.mxu1 %v560_v0  ;;  %v562_v2 = vld [vmem:[%s802_s0] sm:$0xff]   ;;  %v564_v4 = vld [vmem:[%s802_s0 + $0x8] sm:$0xff]   ;;  %v567_v7 = vld [vmem:[%s802_s0 + $0x30] sm:$0xff]  }
   0x3   :  { %537 = vmatpush3.bf16.msra.mxu0 %v560_v0  ;;  %558 = vmatpush3.bf16.msra.mxu1 %v560_v0  ;;  %v563_v3 = vld [vmem:[%s802_s0 + $0x20] sm:$0xff]   ;;  %v565_v5 = vld [vmem:[%s802_s0 + $0x28] sm:$0xff]   ;;  %v568_v8 = vld [vmem:[%s802_s0 + $0x18] sm:$0xff]  }
   0x4   :  { %538 = vmatprep.subr.bf16.mxu0 %v561_v1  ;;  %557 = vmatprep.subr.bf16.mxu1 %v561_v1  ;;  %v569_v9 = vld [vmem:[%s802_s0 + $0x38] sm:$0xff]   ;;  %v695_v10 = vld [vmem:[%s803_s2] ss:$0 sm:$0xff] }
   0x5   :  { %540 = vmatprep.mubr.msk.bf16.mxu0 %vm94_vm0, %v562_v2  ;;  %548 = vmatprep.mubr.msk.bf16.mxu1 %vm94_vm0, %v563_v3 }
   0x7   :  { %539 = vmatpush3.bf16.msra.mxu0 %v561_v1  ;;  %559 = vmatpush3.bf16.msra.mxu1 %v561_v1 }
   0xa   :  { %541 = vmatmul.mubr.msk.bf16.vlgmr.msra.gmra.mrb[0].mxu0 %vm94_vm0, %v564_v4  ;;  %549 = vmatmul.mubr.msk.bf16.vlgmr.msra.gmra.mrb[0].mxu1 %vm94_vm0, %v565_v5 }
   0xb   :  { %544 = vmatprep.mubr.msk.bf16.mxu0 %vm94_vm0, %v566_v6  ;;  %552 = vmatprep.mubr.msk.bf16.mxu1 %vm94_vm0, %v567_v7 }
  0x12   :  { %545 = vmatmul.mubr.msk.bf16.gmra.mrb[4].mxu0 %vm94_vm0, %v568_v8  ;;  %553 = vmatmul.mubr.msk.bf16.gmra.mrb[4].mxu1 %vm94_vm0, %v569_v9 }
  0xdd   :  { %v542_v11 = vpop.f32.mrb[0].mxu0  ;;  %v550_v12 = vpop.f32.mrb[0].mxu1 }
  0xde   :  { %v698_v13 = vadd.f32 %v542_v11, %v695_v10  ;;  %v701_v14 = vadd.f32 %v550_v12, %v695_v10  ;;  %v153_v15 = vpop.f32.mrb[1].mxu0  ;;  %v185_v16 = vpop.f32.mrb[1].mxu1 }
  0xdf   :  { %v704_v17 = vadd.f32 %v695_v10, %v153_v15  ;;  %v707_v18 = vadd.f32 %v695_v10, %v185_v16  ;;  %v543_v19 = vpop.f32.mrb[2].mxu0  ;;  %v551_v20 = vpop.f32.mrb[2].mxu1 }
  0xe0   :  { %v433_v21 = vmul.f32 -1.442695, %v698_v13  ;;  %v441_v22 = vmul.f32 -1.442695, %v701_v14  ;;  %v712_v23 = vadd.f32 %v543_v19, %v695_v10  ;;  %v715_v24 = vadd.f32 %v551_v20, %v695_v10  ;;  %v156_v25 = vpop.f32.mrb[3].mxu0  ;;  %v188_v26 = vpop.f32.mrb[3].mxu1 }
  0xe1   :  { %v431_v27 = vmul.f32 -1.442695, %v704_v17  ;;  %v439_v28 = vmul.f32 -1.442695, %v707_v18  ;;  %v720_v29 = vadd.f32 %v695_v10, %v156_v25  ;;  %v723_v30 = vadd.f32 %v695_v10, %v188_v26 }
  0xe2   :  { %570 = vpow2.f32 %v433_v21  ;;  %v434_v31 = vmul.f32 -1.442695, %v712_v23  ;;  %v442_v32 = vmul.f32 -1.442695, %v715_v24 }
  0xe3   :  { %572 = vpow2.f32 %v441_v22  ;;  %v432_v33 = vmul.f32 -1.442695, %v720_v29  ;;  %v440_v34 = vmul.f32 -1.442695, %v723_v30 }
  0xe4   :  { %574 = vpow2.f32 %v431_v27 }
  0xe5   :  { %576 = vpow2.f32 %v439_v28  ;;  %v546_v35 = vpop.f32.mrb[4].mxu0  ;;  %v554_v36 = vpop.f32.mrb[4].mxu1 }
  0xe6   :  { %578 = vpow2.f32 %v434_v31  ;;  %v730_v37 = vadd.f32 %v546_v35, %v695_v10  ;;  %v733_v38 = vadd.f32 %v554_v36, %v695_v10  ;;  %v169_v39 = vpop.f32.mrb[5].mxu0  ;;  %v201_v40 = vpop.f32.mrb[5].mxu1 }
  0xe7   :  { %580 = vpow2.f32 %v442_v32  ;;  %v736_v41 = vadd.f32 %v695_v10, %v169_v39  ;;  %v547_v42 = vpop.f32.mrb[6].mxu0  ;;  %v555_v43 = vpop.f32.mrb[6].mxu1  ;;  %v746_v58 = vadd.f32 %v695_v10, %v201_v40 }
  0xe8   :  { %582 = vpow2.f32 %v432_v33  ;;  %v437_v44 = vmul.f32 -1.442695, %v730_v37  ;;  %v445_v45 = vmul.f32 -1.442695, %v733_v38  ;;  %v741_v46 = vadd.f32 %v547_v42, %v695_v10  ;;  %v172_v47 = vpop.f32.mrb[7].mxu0  ;;  %v204_v48 = vpop.f32.mrb[7].mxu1 }
  0xe9   :  { %584 = vpow2.f32 %v440_v34  ;;  %v435_v49 = vmul.f32 -1.442695, %v736_v41  ;;  %v443_v3 = vmul.f32 -1.442695, %v746_v58  ;;  %v750_v6 = vadd.f32 %v555_v43, %v695_v10 }
  0xea   :  { %586 = vpow2.f32 %v437_v44  ;;  %v438_v50 = vmul.f32 -1.442695, %v741_v46  ;;  %v753_v8 = vadd.f32 %v695_v10, %v172_v47  ;;  %v756_v11 = vadd.f32 %v695_v10, %v204_v48 }
  0xeb   :  { %588 = vpow2.f32 %v445_v45  ;;  %v446_v16 = vmul.f32 -1.442695, %v750_v6 }
  0xec   :  { %v571_v51 = vpop.eup %570  ;;  %590 = vpow2.f32 %v435_v49  ;;  %v436_v21 = vmul.f32 -1.442695, %v753_v8  ;;  %v444_v25 = vmul.f32 -1.442695, %v756_v11 }
  0xed   :  { %v573_v52 = vpop.eup %572  ;;  %v266_v53 = vadd.f32 1.0, %v571_v51  ;;  %592 = vpow2.f32 %v438_v50 }
  0xee   :  { %v575_v54 = vpop.eup %574  ;;  %v274_v55 = vadd.f32 1.0, %v573_v52 }
  0xef   :  { %v577_v56 = vpop.eup %576  ;;  %594 = vrcp.f32 %v266_v53  ;;  %v264_v57 = vadd.f32 1.0, %v575_v54 }
  0xf0   :  { %v579_v59 = vpop.eup %578  ;;  %596 = vrcp.f32 %v274_v55  ;;  %v272_v60 = vadd.f32 1.0, %v577_v56 }
  0xf1   :  { %v581_v61 = vpop.eup %580  ;;  %598 = vrcp.f32 %v264_v57  ;;  %v267_v62 = vadd.f32 1.0, %v579_v59 }
  0xf2   :  { %v583_v63 = vpop.eup %582  ;;  %600 = vrcp.f32 %v272_v60  ;;  %v275_v0 = vadd.f32 1.0, %v581_v61 }
  0xf3   :  { %v585_v1 = vpop.eup %584  ;;  %602 = vrcp.f32 %v267_v62  ;;  %v265_v2 = vadd.f32 1.0, %v583_v63 }
  0xf4   :  { %v587_v4 = vpop.eup %586  ;;  %604 = vrcp.f32 %v275_v0  ;;  %v273_v5 = vadd.f32 1.0, %v585_v1 }
  0xf5   :  { %606 = vrcp.f32 %v265_v2  ;;  %v270_v7 = vadd.f32 1.0, %v587_v4  ;;  %v589_v9 = vpop.eup %588 }
  0xf6   :  { %608 = vrcp.f32 %v273_v5  ;;  %v591_v12 = vpop.eup %590 }
  0xf7   :  { %610 = vpow2.f32 %v443_v3  ;;  %v593_v15 = vpop.eup %592 }
  0xf8   :  { %612 = vrcp.f32 %v270_v7  ;;  %v271_v20 = vadd.f32 1.0, %v593_v15 }
  0xf9   :  { %v595_v19 = vpop.eup %594 }
  0xfa   :  { %v597_v22 = vpop.eup %596  ;;  %614 = vrcp.f32 %v271_v20  ;;  %v314_v31 = vmul.f32 %v595_v19, %v698_v13 }
  0xfb   :  { %v599_v26 = vpop.eup %598  ;;  %616 = vpow2.f32 %v446_v16  ;;  %v322_v34 = vmul.f32 %v597_v22, %v701_v14  ;;  %v278_v14 = vadd.f32 1.0, %v589_v9 }
  0xfc   :  { %v601_v27 = vpop.eup %600  ;;  %618 = vpow2.f32 %v436_v21  ;;  %v312_v39 = vmul.f32 %v599_v26, %v704_v17 }
  0xfd   :  { %v603_v28 = vpop.eup %602  ;;  %620 = vpow2.f32 %v444_v25  ;;  %v320_v44 = vmul.f32 %v601_v27, %v707_v18 }
  0xfe   :  { %v605_v10 = vpop.eup %604  ;;  %v315_v32 = vmul.f32 %v603_v28, %v712_v23  ;;  %622 = vrcp.f32 %v278_v14 }
  0xff   :  { %v607_v33 = vpop.eup %606  ;;  %v323_v35 = vmul.f32 %v605_v10, %v715_v24  ;;  %v268_v24 = vadd.f32 1.0, %v591_v12 }
 0x100   :  { %v609_v36 = vpop.eup %608  ;;  %v487_v40 = vpack.c.bf16 %v315_v32, %v314_v31  ;;  %v313_v42 = vmul.f32 %v607_v33, %v720_v29 }
 0x101   :  { %v611_v43 = vpop.eup %610  ;;  %v507_v45 = vpack.c.bf16 %v323_v35, %v322_v34  ;;  %v321_v13 = vmul.f32 %v609_v36, %v723_v30  ;;  %624 = vrcp.f32 %v268_v24 }
 0x102   :  { %519 = vst [vmem:[%s804_s3 + $0x8] sm:$0xff] %v487_v40   ;;  %v482_v23 = vpack.c.bf16 %v313_v42, %v312_v39  ;;  %v613_v47 = vpop.eup %612  ;;  %v276_v18 = vadd.f32 1.0, %v611_v43 }
 0x103   :  { %523 = vst [vmem:[%s804_s3 + $0x28] sm:$0xff] %v507_v45   ;;  %v502_v17 = vpack.c.bf16 %v321_v13, %v320_v44  ;;  %v318_v48 = vmul.f32 %v613_v47, %v730_v37 }
 0x104   :  { %483 = vst [vmem:[%s804_s3] sm:$0xff] %v482_v23   ;;  %v615_v29 = vpop.eup %614  ;;  %626 = vrcp.f32 %v276_v18 }
 0x105   :  { %522 = vst [vmem:[%s804_s3 + $0x20] sm:$0xff] %v502_v17   ;;  %v617_v30 = vpop.eup %616  ;;  %v319_v49 = vmul.f32 %v615_v29, %v741_v46 }
 0x106   :  { %v619_v50 = vpop.eup %618  ;;  %v279_v51 = vadd.f32 1.0, %v617_v30 }
 0x107   :  { %v621_v52 = vpop.eup %620  ;;  %v497_v53 = vpack.c.bf16 %v319_v49, %v318_v48  ;;  %v269_v54 = vadd.f32 1.0, %v619_v50 }
 0x108   :  { %628 = vrcp.f32 %v279_v51  ;;  %v277_v55 = vadd.f32 1.0, %v621_v52  ;;  %v623_v56 = vpop.eup %622 }
 0x109   :  { %521 = vst [vmem:[%s804_s3 + $0x18] sm:$0xff] %v497_v53   ;;  %630 = vrcp.f32 %v269_v54  ;;  %v326_v60 = vmul.f32 %v623_v56, %v733_v38 }
 0x10a   :  { %632 = vrcp.f32 %v277_v55 }
 0x10b   :  { %v625_v37 = vpop.eup %624 }
 0x10c   :  { %v316_v63 = vmul.f32 %v625_v37, %v736_v41 }
 0x10e   :  { %v627_v57 = vpop.eup %626 }
 0x10f   :  { %v324_v1 = vmul.f32 %v627_v57, %v746_v58 }
 0x112   :  { %v629_v59 = vpop.eup %628 }
 0x113   :  { %v631_v46 = vpop.eup %630  ;;  %v327_v61 = vmul.f32 %v629_v59, %v750_v6 }
 0x114   :  { %v633_v62 = vpop.eup %632  ;;  %v317_v0 = vmul.f32 %v631_v46, %v753_v8 }
 0x115   :  { %v517_v2 = vpack.c.bf16 %v327_v61, %v326_v60  ;;  %v325_v3 = vmul.f32 %v633_v62, %v756_v11 }
 0x116   :  { %v492_v4 = vpack.c.bf16 %v317_v0, %v316_v63 }
 0x117   :  { %525 = vst [vmem:[%s804_s3 + $0x38] sm:$0xff] %v517_v2   ;;  %v512_v5 = vpack.c.bf16 %v325_v3, %v324_v1 }
 0x118   :  { %520 = vst [vmem:[%s804_s3 + $0x10] sm:$0xff] %v492_v4  }
 0x119   :  { %524 = vst [vmem:[%s804_s3 + $0x30] sm:$0xff] %v512_v5  }

</bundles_post_ra>
